<compile_context>
chip_gen: v7x
topology: tpu7x:2x2x1
jax: 0.10.0
libtpu: 0.0.40
codegen_flags: <defaults>
</compile_context>

<pallas_src>
import jax
import jax.numpy as jnp
from jax.experimental import pallas as pl
from jax.experimental.pallas import tpu as pltpu


def _wsa_kernel(de_ref, wv_ref, wo_ref, bv_ref, bo_ref, out_ref):
    """One grid step == one tile of TB batch elements.

    de_ref : (TBd, D)   TBd == TB, or 1 when dE is shared across the batch
    wv_ref : (D, D)  Wv^T (in_dim, out_dim)     wo_ref : (D, D)  Wo^T
    bv_ref : (1, D)                             bo_ref : (1, D)
    out_ref: (TB, Lq, D)
    """
    de = de_ref[...].astype(jnp.float32)                         # (TBd, D)

    # F.normalize(x, dim=-1): x / max(||x||, 1e-12)  ==  x * rsqrt(max(||x||^2, 1e-24))
    # rsqrt goes to the (otherwise idle) EUP slot; keep this path in f32.
    ssq = jnp.sum(de * de, axis=-1, keepdims=True)
    de_n = de * jax.lax.rsqrt(jnp.maximum(ssq, jnp.float32(1e-24)))

    # Two small GEMMs replace the entire attention block (see header note).
    v1 = jnp.dot(de_n, wv_ref[...], preferred_element_type=jnp.float32) + bv_ref[...]
    row = jnp.dot(v1, wo_ref[...], preferred_element_type=jnp.float32) + bo_ref[...]

    # All Lq output rows of a batch element are identical -> broadcast store
    # along the sublane (Lq) axis.  Handles both TBd == TB and TBd == 1.
    out_ref[...] = jnp.broadcast_to(row[:, None, :], out_ref.shape).astype(out_ref.dtype)


def _pick_batch_tile(B, max_tile=128):
    """Largest divisor of B that is <= max_tile while keeping >= 2 grid steps
    when possible, so the batch axis can shard across TensorCores (v7x)."""
    best = 1
    for tb in range(1, min(B, max_tile) + 1):
        if B % tb == 0 and (B // tb >= 2 or B == 1):
            best = tb
    return best


def wsa_forward(q_w, dE, params, *, heads=4):
    """q_w: (B, Lq, D) f32, dE: (1 or B, 1, D) f32.

    Note: under the module's semantics (single value row broadcast over Lq),
    the output values provably do not depend on q_w, so q_w is not DMA'd into
    the kernel at all; it only determines the output shape.
    """
    B, Lq, D = q_w.shape
    Bd = dE.shape[0]
    if Bd != 1 and Bd != B:
        raise ValueError("Batch size of dE must be 1 or equal to q_w")
    assert dE.shape[1] == 1, "dE must have sequence length 1 (Ld=1)"
    assert D % heads == 0  # heads only partition dims; result is head-independent

    # torch layout -> kernel layout: pre-transpose weights, 2-D biases.
    wvT = params["wv"].T
    woT = params["wo"].T
    bv = params["bv"].reshape(1, D)
    bo = params["bo"].reshape(1, D)

    # Batch-block the grid (multiple batch rows per step -> bigger GEMM M),
    # but keep >= 2 grid steps when possible for megacore sharding.
    tb = _pick_batch_tile(B)
    grid = (B // tb,)

    # Do NOT materialize the dE broadcast in HBM: when dE is shared (Bd == 1)
    # its index_map simply always returns block 0.
    tbd = tb if Bd == B else 1
    de_map = (lambda b: (b, 0, 0)) if Bd == B else (lambda b: (0, 0, 0))

    wspec = pl.BlockSpec((D, D), lambda b: (0, 0))
    bspec = pl.BlockSpec((1, D), lambda b: (0, 0))

    return pl.pallas_call(
        _wsa_kernel,
        out_shape=jax.ShapeDtypeStruct((B, Lq, D), jnp.float32),
        grid_spec=pltpu.PrefetchScalarGridSpec(
            num_scalar_prefetch=0,
            grid=grid,
            in_specs=[
                pl.BlockSpec((tbd, None, D), de_map),   # dE (seq dim squeezed)
                wspec, wspec,                           # Wv^T, Wo^T
                bspec, bspec,                           # bv, bo
            ],
            out_specs=pl.BlockSpec((tb, Lq, D), lambda b: (b, 0, 0)),
        ),
        compiler_params=pltpu.CompilerParams(dimension_semantics=("parallel",)),
    )(dE, wvT, woT, bv, bo)


def wsa_reference(q_w, dE, params, *, heads=4):
    """Pure-JAX reference with the FULL multi-head attention math (mirrors
    torch.nn.MultiheadAttention), used to validate the algebraic shortcut."""
    B, Lq, D = q_w.shape
    if dE.shape[0] == 1 and B > 1:
        dE = jnp.broadcast_to(dE, (B, 1, D))
    nrm = lambda x: x / jnp.maximum(
        jnp.sqrt(jnp.sum(x * x, axis=-1, keepdims=True)), 1e-12)
    qn, dn = nrm(q_w), nrm(dE)
    fused = qn + dn
    q = fused @ params["wq"].T + params["bq"]
    k = fused @ params["wk"].T + params["bk"]
    v = jnp.broadcast_to(dn @ params["wv"].T + params["bv"], (B, Lq, D))
    dh = D // heads
    qh = q.reshape(B, Lq, heads, dh).transpose(0, 2, 1, 3)
    kh = k.reshape(B, Lq, heads, dh).transpose(0, 2, 1, 3)
    vh = v.reshape(B, Lq, heads, dh).transpose(0, 2, 1, 3)
    s = jnp.einsum("bhqd,bhkd->bhqk", qh, kh) / jnp.sqrt(jnp.float32(dh))
    p = jax.nn.softmax(s, axis=-1)
    o = jnp.einsum("bhqk,bhkd->bhqd", p, vh).transpose(0, 2, 1, 3).reshape(B, Lq, D)
    return o @ params["wo"].T + params["bo"]


def make_params(dim, key):
    """Deterministic synthetic MHA parameters (torch layout: W is (out, in))."""
    ks = jax.random.split(key, 8)
    bound = (6.0 / (4 * dim)) ** 0.5
    u = lambda k, shape, b: jax.random.uniform(k, shape, jnp.float32, -b, b)
    return {
        "wq": u(ks[0], (dim, dim), bound),
        "wk": u(ks[1], (dim, dim), bound),
        "wv": u(ks[2], (dim, dim), bound),
        "wo": u(ks[3], (dim, dim), (1.0 / dim) ** 0.5),
        "bq": u(ks[4], (dim,), 0.1),
        "bk": u(ks[5], (dim,), 0.1),
        "bv": u(ks[6], (dim,), 0.1),
        "bo": u(ks[7], (dim,), 0.1),
    }


if __name__ == "__main__":
    B, Lq, D, H = 2, 8, 32, 4
    key = jax.random.PRNGKey(0)
    k_qw, k_de1, k_deb, k_par = jax.random.split(key, 4)

    q_w = jax.random.normal(k_qw, (B, Lq, D), jnp.float32)
    dE_shared = jax.random.normal(k_de1, (1, 1, D), jnp.float32)   # batch-1 dE (shared)
    dE_batch = jax.random.normal(k_deb, (B, 1, D), jnp.float32)    # per-batch dE
    params = make_params(D, k_par)

    for dE in (dE_shared, dE_batch):
        out = jax.block_until_ready(wsa_forward(q_w, dE, params, heads=H))
        ref = wsa_reference(q_w, dE, params, heads=H)
        assert out.shape == (B, Lq, D)
        assert jnp.allclose(out, ref, atol=1e-5, rtol=1e-5), "mismatch vs JAX reference"

    print("KERNEL_OK")
</pallas_src>

<mosaic_0001>
module attributes {stable_mosaic.version = 11 : i64} {
  func.func @_wsa_kernel(%arg0: i32, %arg1: memref<1x1x32xf32, #tpu.memory_space<vmem>>, %arg2: memref<32x32xf32, #tpu.memory_space<vmem>>, %arg3: memref<32x32xf32, #tpu.memory_space<vmem>>, %arg4: memref<1x32xf32, #tpu.memory_space<vmem>>, %arg5: memref<1x32xf32, #tpu.memory_space<vmem>>, %arg6: memref<1x8x32xf32, #tpu.memory_space<vmem>>) attributes {dimension_semantics = [#tpu.dimension_semantics<parallel>], iteration_bounds = array<i64: 2>, scalar_prefetch = 0 : i64, scratch_operands = 0 : i64, tpu.core_type = #tpu.core_type<tc>, window_params = [{pipeline_mode = #tpu.pipeline_mode<synchronous>, transform_indices = @transform_0, window_bounds = array<i64: 1, 1, 32>}, {pipeline_mode = #tpu.pipeline_mode<synchronous>, transform_indices = @transform_1, window_bounds = array<i64: 32, 32>}, {pipeline_mode = #tpu.pipeline_mode<synchronous>, transform_indices = @transform_2, window_bounds = array<i64: 32, 32>}, {pipeline_mode = #tpu.pipeline_mode<synchronous>, transform_indices = @transform_3, window_bounds = array<i64: 1, 32>}, {pipeline_mode = #tpu.pipeline_mode<synchronous>, transform_indices = @transform_4, window_bounds = array<i64: 1, 32>}, {transform_indices = @transform_5, window_bounds = array<i64: 1, 8, 32>}]} {
    %c0 = arith.constant 0 : index
    %c0_0 = arith.constant 0 : index
    %c0_1 = arith.constant 0 : index
    %0 = vector.load %arg1[%c0, %c0_0, %c0_1] : memref<1x1x32xf32, #tpu.memory_space<vmem>>, vector<1x1x32xf32>
    %1 = vector.shape_cast %0 : vector<1x1x32xf32> to vector<1x32xf32>
    %2 = arith.mulf %1, %1 : vector<1x32xf32>
    %cst = arith.constant dense<0.000000e+00> : vector<1xf32>
    %3 = vector.multi_reduction <add>, %2, %cst [1] : vector<1x32xf32> to vector<1xf32>
    %4 = vector.shape_cast %3 : vector<1xf32> to vector<1x1xf32>
    %cst_2 = arith.constant 1.000000e-24 : f32
    %5 = vector.broadcast %cst_2 : f32 to vector<1x1xf32>
    %6 = arith.maximumf %4, %5 : vector<1x1xf32>
    %7 = math.rsqrt %6 : vector<1x1xf32>
    %8 = vector.broadcast %7 : vector<1x1xf32> to vector<1x32xf32>
    %9 = arith.mulf %1, %8 : vector<1x32xf32>
    %c0_3 = arith.constant 0 : index
    %c0_4 = arith.constant 0 : index
    %10 = vector.load %arg2[%c0_3, %c0_4] : memref<32x32xf32, #tpu.memory_space<vmem>>, vector<32x32xf32>
    %cst_5 = arith.constant dense<0.000000e+00> : vector<1x32xf32>
    %11 = tpu.matmul %9, %10, %cst_5 {dimension_numbers = #tpu.dot_dimension_numbers<[1], [0], [0], [1], [0, 0, 1, 1], [], []>} : vector<1x32xf32>, vector<32x32xf32>, vector<1x32xf32> -> vector<1x32xf32>
    %c0_6 = arith.constant 0 : index
    %c0_7 = arith.constant 0 : index
    %12 = vector.load %arg4[%c0_6, %c0_7] : memref<1x32xf32, #tpu.memory_space<vmem>>, vector<1x32xf32>
    %13 = arith.addf %11, %12 : vector<1x32xf32>
    %c0_8 = arith.constant 0 : index
    %c0_9 = arith.constant 0 : index
    %14 = vector.load %arg3[%c0_8, %c0_9] : memref<32x32xf32, #tpu.memory_space<vmem>>, vector<32x32xf32>
    %cst_10 = arith.constant dense<0.000000e+00> : vector<1x32xf32>
    %15 = tpu.matmul %13, %14, %cst_10 {dimension_numbers = #tpu.dot_dimension_numbers<[1], [0], [0], [1], [0, 0, 1, 1], [], []>} : vector<1x32xf32>, vector<32x32xf32>, vector<1x32xf32> -> vector<1x32xf32>
    %c0_11 = arith.constant 0 : index
    %c0_12 = arith.constant 0 : index
    %16 = vector.load %arg5[%c0_11, %c0_12] : memref<1x32xf32, #tpu.memory_space<vmem>>, vector<1x32xf32>
    %17 = arith.addf %15, %16 : vector<1x32xf32>
    %18 = vector.shape_cast %17 : vector<1x32xf32> to vector<1x1x32xf32>
    %19 = vector.shape_cast %18 : vector<1x1x32xf32> to vector<1x1x32xf32>
    %20 = vector.broadcast %19 : vector<1x1x32xf32> to vector<1x8x32xf32>
    %c0_13 = arith.constant 0 : index
    %c0_14 = arith.constant 0 : index
    %c0_15 = arith.constant 0 : index
    %21 = vector.load %arg6[%c0_13, %c0_14, %c0_15] : memref<1x8x32xf32, #tpu.memory_space<vmem>>, vector<1x8x32xf32>
    tpu.vector_store %arg6[%c0_13, %c0_14, %c0_15], %20 {strides = array<i32>} : memref<1x8x32xf32, #tpu.memory_space<vmem>>, vector<1x8x32xf32>,
    return
  }
  func.func @transform_0(%arg0: i32) -> (i32, i32, i32) {
    %c0_i32 = arith.constant 0 : i32
    %c0_i32_0 = arith.constant 0 : i32
    %c0_i32_1 = arith.constant 0 : i32
    %c0_i32_2 = arith.constant 0 : i32
    return %c0_i32, %c0_i32_0, %c0_i32_1 : i32, i32, i32
  }
  func.func @transform_1(%arg0: i32) -> (i32, i32) {
    %c0_i32 = arith.constant 0 : i32
    %c0_i32_0 = arith.constant 0 : i32
    %c0_i32_1 = arith.constant 0 : i32
    return %c0_i32, %c0_i32_0 : i32, i32
  }
  func.func @transform_2(%arg0: i32) -> (i32, i32) {
    %c0_i32 = arith.constant 0 : i32
    %c0_i32_0 = arith.constant 0 : i32
    %c0_i32_1 = arith.constant 0 : i32
    return %c0_i32, %c0_i32_0 : i32, i32
  }
  func.func @transform_3(%arg0: i32) -> (i32, i32) {
    %c0_i32 = arith.constant 0 : i32
    %c0_i32_0 = arith.constant 0 : i32
    %c0_i32_1 = arith.constant 0 : i32
    return %c0_i32, %c0_i32_0 : i32, i32
  }
  func.func @transform_4(%arg0: i32) -> (i32, i32) {
    %c0_i32 = arith.constant 0 : i32
    %c0_i32_0 = arith.constant 0 : i32
    %c0_i32_1 = arith.constant 0 : i32
    return %c0_i32, %c0_i32_0 : i32, i32
  }
  func.func @transform_5(%arg0: i32) -> (i32, i32, i32) {
    %c0_i32 = arith.constant 0 : i32
    %c0_i32_0 = arith.constant 0 : i32
    %c0_i32_1 = arith.constant 0 : i32
    return %arg0, %c0_i32, %c0_i32_0 : i32, i32, i32
  }
}

</mosaic_0001>

<bundles_post_ra>
// kernel: tpu_custom_call.1
= control target key start
LH: loop header
LB: loop body
LE: loop exit
PB: predicated region body
PF: predicated region fallthrough
CT: control target
= control target key end

     0   :  { %10 = vsyncpa [#allocation3], 0  ;;  %s1051_s0 = inlined_call_operand.hbm [shape: f32[1,1,32], index: 0, kind: input, shape index: {}]   ;;  %s1052_s1 = inlined_call_operand.hbm [shape: f32[32,32], index: 1, kind: input, shape index: {}]   ;;  %s1053_s2 = inlined_call_operand.hbm [shape: f32[32,32], index: 2, kind: input, shape index: {}]   ;;  %s1054_s3 = inlined_call_operand.vmem [shape: f32[1,32], index: 3, kind: input, shape index: {}]   ;;  %s1055_s4 = inlined_call_operand.vmem [shape: f32[1,32], index: 4, kind: input, shape index: {}]   ;;  %s1056_s5 = inlined_call_operand.hbm [shape: f32[2,8,32], index: 5, kind: output, shape index: {}]  }
   0x1   :  { %11 = vsyncpa [#allocation6], 0 }
   0x2   :  { %12 = vsyncpa [#allocation4], 0 }
   0x3   :  { %14 = vsyncpa [#allocation4 + $0x1], 0  ;;  %s840_s18 = smov 0   ;;  %s842_s19 = smov 0  }
   0x4   :  { %s844_s20 = smov 0   ;;  %s846_s21 = smov 0  }
   0x5 LB: > { %s861_s22 = sadd.s32 4294967295, %s799_s21   ;;  %s508_s23 = sadd.s32 4294967294, %s799_s21   ;;  %s799_s21 = sphi %s846_s21, %s1077_s21   ;;  %s795_s20 = sphi %s844_s20, %s1076_s20   ;;  %s791_s19 = sphi %s842_s19, %s1075_s19   ;;  %s787_s18 = sphi %s840_s18, %s1074_s18  }
   0x6   : > { %s865_s24 = sadd.s32 1, %s799_s21   ;;  %s132_s25 = sadd.s32 1, %s795_s20 }
   0x7   : > { %s129_s26 = ssub.s32 %s799_s21, %s865_s24  ;;  %p142_p0 = scmp.ne.s32.totalorder %s795_s20, %s791_s19 }
   0x8   : > { %p130_p1 = scmp.eq.s32.totalorder %s129_s26, 0  ;;  %p143_p2 = scmp.eq.s32.totalorder %s861_s22, 1 }
   0x9   : > { %p148_p3 = scmp.ne.s32.totalorder %s791_s19, %s787_s18  ;;  %p149_p4 = scmp.eq.s32.totalorder %s508_s23, 1 }
   0xa   : > { %s876_s27 = scalar_select %p130_p1, %s795_s20, %s132_s25  }
   0xb   : > { %p878_p5 = por %p143_p2, %p142_p0  ;;  %p882_p6 = por %p149_p4, %p148_p3 }
   0xc   : > { %1060 = sst [smem:[#allocation12_spill]] %s876_s27  ;;  %p509_p7 = scmp.ge.s32.totalorder %s799_s21, 1 }
   0xd   : > { %s1061_s28 = scalar_select %p878_p5, 1, 0 }
   0xe   : > { %s1062_s29 = scalar_select %p882_p6, 1, 0 }
   0xf   : > { %p156_p8 = scmp.lt.s32.totalorder %s799_s21, 3  ;;  %p1057_p9 = scmp.eq.s32.totalorder %s861_s22, 0 }
  0x10   : > { %s801_s6 = smov [#allocation5]   ;;  %s802_s9 = smov [#allocation2]  }
  0x11   : > { %p889_p10 = pnand %p509_p7, %p156_p8  ;;  %s179_s7 = sshll.u32 %s801_s6, 4  ;;  %s895_s7 = int_to_ptr.vmem [resolvable:$true] %s179_s7 }
  0x12   : > { %s169_s10 = sshll.u32 %s802_s9, 4  ;;  %s803_s11 = smov [#allocation7]   ;;  %s903_s10 = int_to_ptr.vmem [resolvable:$true] %s169_s10 }
  0x13   : > { %s1063_s30 = scalar_select %p889_p10, 1, 0 }
  0x14   : > { %p582_p11 = pneg %p889_p10  ;;  %s905_s12 = sshll.u32 %s803_s11, 4  ;;  %s193_s12 = int_to_ptr.vmem [resolvable:$true] %s905_s12 }
  0x15   : > { %s645_s15 = scalar_lea.hbm %s1052_s1, 512 }
  0x16   : > { %p899_p12 = pnand %p1057_p9, %p582_p11  ;;  %p646_p13 = scmp.ne.s32.totalorder %s1052_s1, %s645_s15 }
  0x17   : > { %p652_p3 = scmp.lt.u32.totalorder %s645_s15, %s1052_s1 }
  0x18   : > { %p915_p0 = pneg %p899_p12 }
  0x1a   : > { %p648_p1 = pnand %p915_p0, %p646_p13 }
  0x1c   : > { %p649_p2 = pneg %p648_p1 }
  0x1e   : > { %p654_p4 = pnand %p652_p3, %p649_p2 }
  0x20   : > { %657 = shalt.err (!%p654_p4)
}
  0x21   : > { %s658_s6 = scalar_lea.vmem %s895_s7, 512  ;;  %p666_p9 = scmp.lt.s32.totalorder %s895_s7, %s895_s7 }
  0x22   : > { %p659_p7 = scmp.ne.s32.totalorder %s895_s7, %s658_s6  ;;  %p667_p6 = scmp.lt.s32.totalorder %s658_s6, %s658_s6 }
  0x24   : > { %p661_p8 = pnand %p659_p7, %p915_p0  ;;  %p668_p13 = por %p667_p6, %p666_p9 }
  0x26   : > { %p662_p11 = pneg %p661_p8 }
  0x28   : > { %p669_p1 = pnand %p668_p13, %p662_p11 }
  0x2a   : > { %672 = shalt.err (!%p669_p1)
}
  0x2b   : > { %s804_s9 = smov 128   ;;  %s805_s11 = smov 8  }
  0x2c   : > { %588 = dma.hbm_to_vmem [thread:$0]  (!%p899_p12), %s1052_s1, 512, %s895_s7, [#allocation6], %s804_s9, %s804_s9, %s805_s11  }
  0x2d   : > { %s673_s17 = scalar_lea.hbm %s1051_s0, 16 }
  0x2e   : > { %p674_p6 = scmp.ne.s32.totalorder %s1051_s0, %s673_s17  ;;  %p680_p3 = scmp.lt.u32.totalorder %s673_s17, %s1051_s0 }
  0x30   : > { %p676_p9 = pnand %p674_p6, %p915_p0 }
  0x32   : > { %p677_p2 = pneg %p676_p9 }
  0x34   : > { %p682_p4 = pnand %p680_p3, %p677_p2 }
  0x36   : > { %685 = shalt.err (!%p682_p4)
}
  0x37   : > { %s686_s7 = scalar_lea.vmem %s903_s10, 16  ;;  %s693_s13 = scalar_lea.vmem %s903_s10, 32 }
  0x38   : > { %p687_p7 = scmp.ne.s32.totalorder %s903_s10, %s686_s7  ;;  %p694_p13 = scmp.lt.s32.totalorder %s903_s10, %s903_s10 }
  0x39   : > { %p695_p1 = scmp.lt.s32.totalorder %s693_s13, %s686_s7 }
  0x3a   : > { %p689_p8 = pnand %p687_p7, %p915_p0 }
  0x3b   : > { %p696_p6 = por %p695_p1, %p694_p13 }
  0x3c   : > { %p690_p11 = pneg %p689_p8 }
  0x3e   : > { %p697_p9 = pnand %p696_p6, %p690_p11 }
  0x40   : > { %700 = shalt.err (!%p697_p9)
}
  0x41   : > { %585 = dma.hbm_to_vmem [thread:$0]  (!%p899_p12), %s1051_s0, 16, %s903_s10, [#allocation3]  }
  0x42   : > { %s701_s17 = scalar_lea.hbm %s1053_s2, 512 }
  0x43   : > { %p702_p2 = scmp.ne.s32.totalorder %s1053_s2, %s701_s17  ;;  %p708_p7 = scmp.lt.u32.totalorder %s701_s17, %s1053_s2 }
  0x45   : > { %p704_p3 = pnand %p702_p2, %p915_p0 }
  0x47   : > { %p705_p4 = pneg %p704_p3 }
  0x49   : > { %p710_p8 = pnand %p708_p7, %p705_p4 }
  0x4b   : > { %713 = shalt.err (!%p710_p8)
}
  0x4c   : > { %s714_s13 = scalar_lea.vmem %s193_s12, 512  ;;  %p722_p6 = scmp.lt.s32.totalorder %s193_s12, %s193_s12 }
  0x4d   : > { %p715_p11 = scmp.ne.s32.totalorder %s193_s12, %s714_s13  ;;  %p723_p9 = scmp.lt.s32.totalorder %s714_s13, %s714_s13 }
  0x4f   : > { %p717_p13 = pnand %p715_p11, %p915_p0  ;;  %p724_p5 = por %p723_p9, %p722_p6 }
  0x51   : > { %p718_p1 = pneg %p717_p13 }
  0x53   : > { %p725_p10 = pnand %p724_p5, %p718_p1 }
  0x55   : > { %728 = shalt.err (!%p725_p10)
}
  0x56   : > { %591 = dma.hbm_to_vmem [thread:$0]  (!%p899_p12), %s1053_s2, 512, %s193_s12, [#allocation6], %s804_s9, %s804_s9, %s805_s11  }
  0x57   : > { %p1066_p2 = scmp.ne.s32.totalorder %s1063_s30, 0 }
  0x58   : > { %p1067_p0 = scmp.eq.s32.totalorder (!%p1066_p2), %s861_s22, 0 }
  0x59   : > { %214 = sbr.rel (%p1066_p2) target bundleno = 705 (0x2c1), region = 40 }
  0x60   : > { %774 = dma.done.wait (%p1067_p0), [#allocation3], 16   ;;  %p1068_p3 = pmov %p1067_p0 }
  0x61   : > { %p1069_p5 = pmov %p1067_p0 }
  0x62   : > { %776 = vsyncadd (%p1068_p3), [#allocation3], 4294967280 }
  0x63   : > { %778 = dma.done.wait (%p1069_p5), [#allocation6], 1024   ;;  %p1070_p10 = pmov %p1067_p0 }
  0x64   : > { %v245_v0 = vld [vmem:[#allocation2] sm:$0x1]  ;;  %vm247_vm0 = vcmask 253952   ;;  %v254_v3 = vld [vmem:[#allocation5] sm:$0xff]  ;;  %v255_v4 = vld [vmem:[#allocation5 + $0x8] sm:$0xff]  ;;  %v806_v6 = vmov 0.0|0.0   ;;  %v411_v25 = vlaneseq }
  0x65   : > { %780 = vsyncadd (%p1070_p10), [#allocation6], 4294966272  ;;  %v246_v1 = vmul.f32 %v245_v0, %v245_v0  ;;  %v256_v5 = vld [vmem:[#allocation5 + $0x10] sm:$0xff]  ;;  %556 = vmatprep.subr.bf16.mxu0 %v806_v6  ;;  %v557_v7 = vpack.c.bf16 %v255_v4, %v254_v3  ;;  %v257_v8 = vld [vmem:[#allocation5 + $0x18] sm:$0xff]  ;;  %vm807_vm1 = vmmov 0   ;;  %v808_v9 = vmov 0.0   ;;  %562 = vmatprep.subr.bf16.mxu1 %v806_v6 }
  0x66   : > { %542 = vmatprep.mubr.msk.f32.mxu0 %vm807_vm1, %v808_v9  ;;  %553 = vmatprep.mubr.msk.f32.mxu1 %vm807_vm1, %v808_v9  ;;  %v560_v10 = vpack.c.bf16 %v257_v8, %v256_v5  ;;  %v333_v11 = vld [vmem:[#allocation7] sm:$0xff]  ;;  %v334_v12 = vld [vmem:[#allocation7 + $0x8] sm:$0xff]  ;;  %vm259_vm2 = vcmask 261120   ;;  %v335_v18 = vld [vmem:[#allocation7 + $0x10] sm:$0xff]  ;;  %s242_s12 = sand.u32 1, %s791_s19   ;;  %v412_v26 = vshrl.u32 %v411_v25, 7 }
  0x67   : > { %v248_v2 = vsel %vm247_vm0, %v246_v1, 0.0  ;;  %558 = vmatpush3.bf16.msra.mxu0 %v557_v7  ;;  %v563_v13 = vpack.c.bf16 %v334_v12, %v333_v11  ;;  %v336_v19 = vld [vmem:[#allocation7 + $0x18] sm:$0xff]  ;;  %s517_s23 = sshll.u32 %s242_s12, 3  ;;  %s521_s14 = sshll.u32 %s861_s22, 7 }
  0x68   : > { %249 = vadd.xlane.f32.xlu0 %v248_v2  ;;  %559 = vmatprep.subr.bf16.mxu0 %v806_v6  ;;  %v566_v20 = vpack.c.bf16 %v336_v19, %v335_v18  ;;  %v258_v21 = vld [vmem:[%s1054_s3] sm:$0x1]  ;;  %v413_v28 = vsub.s32 0, %v412_v26  ;;  %s244_s15 = scalar_lea.vmem [#allocation8], %s517_s23  ;;  %s1008_s26 = scalar_lea.hbm %s1056_s5, %s521_s14 }
  0x69   : > { %564 = vmatpush3.bf16.msra.mxu1 %v563_v13  ;;  %v337_v27 = vld [vmem:[%s1055_s4] sm:$0x1]  ;;  %s430_s16 = sshll.u32 %s244_s15, 4  ;;  %s417_s6 = scalar_lea.sflag [#allocation4], %s242_s12  ;;  %s1010_s16 = int_to_ptr.vmem [resolvable:$true] %s430_s16 }
  0x6a   : > { %565 = vmatprep.subr.bf16.mxu1 %v806_v6  ;;  %s729_s7 = scalar_lea.vmem %s1010_s16, 128  ;;  %p1071_p4 = scmp.ne.s32.totalorder %s1061_s28, 0 }
  0x6b   : > { %561 = vmatpush3.bf16.msra.mxu0 %v560_v10  ;;  %p730_p12 = scmp.ne.s32.totalorder %s1010_s16, %s729_s7  ;;  %s809_s22 = smov [#allocation8]  }
  0x6c   : > { %s733_s13 = sshll.u32 %s809_s22, 4  ;;  %s734_s13 = int_to_ptr.vmem [resolvable:$false] %s733_s13 }
  0x6d   : > { %567 = vmatpush3.bf16.msra.mxu1 %v566_v20  ;;  %p731_p7 = pnand %p730_p12, %p1071_p4  ;;  %s735_s10 = scalar_lea.vmem %s734_s13, 256 }
  0x6e   : > { %p736_p11 = scmp.lt.s32.totalorder %s1010_s16, %s734_s13  ;;  %p737_p13 = scmp.lt.s32.totalorder %s735_s10, %s729_s7 }
  0x6f   : > { %p732_p8 = pneg %p731_p7 }
  0x70   : > { %p738_p1 = por %p737_p13, %p736_p11 }
  0x72   : > { %p739_p6 = pnand %p738_p1, %p732_p8 }
  0xf5   : > { %v250_v14 = vpop.xlane.xlu0 %249 }
  0xf6   : > { %v251_v15 = vmax.f32 %v250_v14, 1e-24 }
  0xf8   : > { %643 = vrsqrt.f32 %v251_v15 }
 0x102   : > { %v644_v16 = vpop.eup %643 }
 0x103   : > { %v253_v17 = vmul.f32 %v644_v16, %v245_v0 }
 0x105   : > { %543 = vmatmul.mubr.msk.f32.vlgmr.msra.gmra.mrb[0].mxu0 %vm259_vm2, %v253_v17 }
 0x1d8   : > { %v329_v22 = vpop.f32.mrb[0].mxu0 }
 0x1d9   : > { %v330_v23 = vadd.f32 %v329_v22, %v258_v21  ;;  %v544_v24 = vpop.f32.mrb[1].mxu0 }
 0x1db   : > { %554 = vmatmul.mubr.msk.f32.vlgmr.msra.gmra.mrb[0].mxu1 %vm259_vm2, %v330_v23 }
 0x2ae   : > { %v407_v29 = vpop.f32.mrb[0].mxu1 }
 0x2af   : > { %v408_v30 = vadd.f32 %v407_v29, %v337_v27  ;;  %v555_v31 = vpop.f32.mrb[1].mxu1 }
 0x2b1   : > { %v414_v32 = vrot.slane %v408_v30, %v413_v28 }
 0x2b3   : > { %415 = vst.msk [vmem:[%s244_s15] sm:$0xff] %vm259_vm2, %v414_v32 }
 0x2b4   : > { %742 = shalt.err (!%p739_p6)
}
 0x2b5   : > { %s743_s27 = scalar_lea.hbm %s1008_s26, 128  ;;  %s747_s12 = scalar_lea.hbm %s1056_s5, 256 }
 0x2b6   : > { %p744_p9 = scmp.ne.s32.totalorder %s1008_s26, %s743_s27  ;;  %p748_p3 = scmp.lt.u32.totalorder %s1008_s26, %s1056_s5 }
 0x2b7   : > { %p749_p5 = scmp.lt.u32.totalorder %s747_s12, %s743_s27  ;;  %p751_p12 = scmp.lt.u32.totalorder %s743_s27, %s1008_s26 }
 0x2b8   : > { %p745_p2 = pnand %p744_p9, %p1071_p4 }
 0x2b9   : > { %p750_p10 = por %p749_p5, %p748_p3 }
 0x2ba   : > { %p746_p0 = pneg %p745_p2 }
 0x2bb   : > { %p752_p7 = por %p751_p12, %p750_p10 }
 0x2bd   : > { %p753_p8 = pnand %p752_p7, %p746_p0 }
 0x2bf   : > { %756 = shalt.err (!%p753_p8)
}
 0x2c0   : > { %580 = dma.vmem_to_hbm [thread:$0]  (%p1071_p4), %s1010_s16, 128, %s1008_s26, %s417_s6  }
 0x2c1 PF: > { %p602_p11 = scmp.ge.s32.totalorder %s799_s21, 2  ;;  %s442_s11 = sand.u32 1, %s787_s18  }
 0x2c2   : > { %p1072_p13 = scmp.ne.s32.totalorder %s1062_s29, 0  ;;  %s443_s14 = scalar_lea.sflag [#allocation4], %s442_s11 }
 0x2c4   : > { %p593_p1 = pnand %p602_p11, %p1072_p13 }
 0x2c6   : > { %782 = dma.done.wait (!%p593_p1), %s443_s14, 128  }
 0x2c7   : > { %784 = vsyncadd (!%p593_p1), %s443_s14, 4294967168  ;;  %s1073_s15 = sld [smem:[#allocation12_spill]]  ;;  %p17_p6 = scmp.ge.s32.totalorder %s865_s24, 4  }
 0x2c8   : > { %s1074_s18 = smov %s791_s19  ;;  %s1075_s19 = smov %s795_s20 }
 0x2c9   : > { %s1077_s21 = smov %s865_s24  ;;  %19 = sbr.rel (!%p17_p6) target bundleno = 5 (0x5), region = 85 }
 0x2cd   : > { %s1076_s20 = smov %s1073_s15 }
 0x2d0   :  { %448 = vsyncpa [#allocation3], 1 }
 0x2d1   :  { %450 = vsyncpa [#allocation3 + $0x1], 1 }
 0x2d2   :  { %451 = vsyncpa [#allocation6], 1 }
 0x2d3   :  { %452 = vsyncpa [#allocation4], 1 }
 0x2d4   :  { %454 = vsyncpa [#allocation4 + $0x1], 1 }

</bundles_post_ra>
